<compile_context>
chip_gen: v7x
topology: tpu7x:2x2x1
jax: 0.10.0
libtpu: 0.0.40
codegen_flags: <defaults>
</compile_context>

<pallas_src>
import functools

import jax
import jax.numpy as jnp
from jax.experimental import pallas as pl
from jax.experimental.pallas import tpu as pltpu


def _quant_unsigned_kernel(params_ref, x_ref, o_ref, *, qmax):
    # params_ref is a (2,) f32 array in SMEM: [step, inv_step] (precomputed in wrapper).
    step = params_ref[0]
    inv_step = params_ref[1]
    x = x_ref[...].astype(jnp.float32)
    xq = jnp.round(x * inv_step)          # VPU multiply + round (half-to-even)
    xq = jnp.clip(xq, 0.0, qmax)          # two compare/selects
    o_ref[...] = (xq * step).astype(o_ref.dtype)


def quant_unsigned(x, max_val, *, num_bits=8,
                   target_block_bytes=2 * 1024 * 1024,
                   donate_input=False):
    """Pallas implementation of QuantUnsigned.forward(x, max).

    x:       floating-point tensor of any shape (e.g. NCHW activations)
    max_val: scalar quantization threshold (the `max` argument of forward)
    """
    levels = 2 ** num_bits
    scale = 1.0 / (levels - 1)
    qmax = float(levels - 1)

    orig_shape = x.shape
    total = x.size
    itemsize = jnp.dtype(x.dtype).itemsize
    sub = max(8, 32 // itemsize)          # sublane multiple: f32->8, bf16->16, int8->32

    flat = x.reshape(-1)                  # free view across the custom-call boundary

    # Widest lane count (multiple of 128) that divides total -> no pad copy needed.
    lane = None
    for cand in (1024, 512, 256, 128):
        if total % cand == 0:
            lane = cand
            break
    if lane is None:
        # Ragged element count (rare for NN activations): minimal pad to a multiple
        # of 128.  This is the only path that materializes a pad + trailing slice.
        lane = 128
        padded_total = ((total + lane - 1) // lane) * lane
        flat = jnp.pad(flat, (0, padded_total - total))
    else:
        padded_total = total
    rows = padded_total // lane
    x2 = flat.reshape(rows, lane)

    # Row tile: at most ~target_block_bytes per block, sublane-aligned; for slabs
    # >= 1 MiB keep at least ~4 grid steps (megacore split + pipeline depth).
    row_bytes = lane * itemsize
    slab_bytes = rows * row_bytes
    tm = max(sub, (target_block_bytes // row_bytes) // sub * sub)
    if slab_bytes >= (1 << 20):
        cap = (rows // 4) // sub * sub
        if cap >= sub:
            tm = min(tm, cap)
    if tm >= rows:
        tm = rows                         # single block; full-extent dim is always legal
    grid = (pl.cdiv(rows, tm),)           # last block may be partial -> OOB writes dropped

    # Scalar parameters computed once (exact f32 divide happens here, not per block).
    step = jnp.asarray(max_val, dtype=jnp.float32).reshape(()) * jnp.float32(scale)
    inv_step = jnp.float32(1.0) / step
    params = jnp.stack([step, inv_step]).astype(jnp.float32)

    cost = pl.CostEstimate(
        flops=5 * total,
        transcendentals=0,
        bytes_accessed=2 * padded_total * itemsize,
    )

    extra_kwargs = {}
    if donate_input and padded_total == total:
        # Quant-dequant is in-place safe; removes one HBM allocation when the caller
        # does not need x afterwards.
        extra_kwargs["input_output_aliases"] = {1: 0}

    out2 = pl.pallas_call(
        functools.partial(_quant_unsigned_kernel, qmax=qmax),
        out_shape=jax.ShapeDtypeStruct(x2.shape, x2.dtype),
        grid=grid,
        in_specs=[
            pl.BlockSpec(memory_space=pltpu.MemorySpace.SMEM),   # [step, inv_step]
            pl.BlockSpec((tm, lane), lambda i: (i, 0)),          # x row tile
        ],
        out_specs=pl.BlockSpec((tm, lane), lambda i: (i, 0)),
        compiler_params=pltpu.CompilerParams(
            dimension_semantics=("parallel",)),
        cost_estimate=cost,
        **extra_kwargs,
    )(params, x2)

    if padded_total != total:
        out2 = out2.reshape(-1)[:total]
    return out2.reshape(orig_shape)


def _reference(x, max_val, num_bits=8):
    """Pure-JAX, divide-based reference (faithful to the torch forward)."""
    levels = 2 ** num_bits
    scale = 1.0 / (levels - 1)
    qmax = float(levels - 1)
    step = jnp.asarray(max_val, dtype=jnp.float32) * scale
    xq = jnp.round(x / step)
    xq = jnp.clip(xq, 0.0, qmax)
    return xq * step


def _check(out, ref, x, step):
    assert out.shape == x.shape and out.dtype == x.dtype
    # The kernel uses x * (1/step) (hoisted scalar reciprocal) while the reference
    # divides; values sitting exactly on a rounding tie may land one quantization
    # level apart.  Allow at most one level anywhere; essentially all must match.
    diff = jnp.abs(out - ref)
    assert float(jnp.max(diff)) <= step + 1e-6, "mismatch > 1 quantization level"
    assert float(jnp.mean((diff < 1e-6).astype(jnp.float32))) > 0.99, \
        "too many elements differ from divide-based reference"


if __name__ == "__main__":
    key = jax.random.PRNGKey(0)
    num_bits = 8
    max_val = jnp.asarray(1.0, dtype=jnp.float32)
    step = float(max_val) / (2 ** num_bits - 1)

    # Primary case: small NCHW activations; range [-0.5, 1.5] exercises both clamps.
    k0, k1, k2 = jax.random.split(key, 3)
    x = jax.random.uniform(k0, (2, 4, 16, 16), dtype=jnp.float32,
                           minval=-0.5, maxval=1.5)
    out = jax.block_until_ready(quant_unsigned(x, max_val, num_bits=num_bits))
    _check(out, _reference(x, max_val, num_bits=num_bits), x, step)

    # Exercise the tiled path with a partial last block (rows=20, tm=8 -> grid=3).
    xb = jax.random.uniform(k1, (5, 4, 32, 32), dtype=jnp.float32,
                            minval=-0.5, maxval=1.5)
    outb = jax.block_until_ready(
        quant_unsigned(xb, max_val, num_bits=num_bits, target_block_bytes=32 * 1024))
    _check(outb, _reference(xb, max_val, num_bits=num_bits), xb, step)

    # Exercise the ragged fallback path (total = 105, not a multiple of 128).
    xr = jax.random.uniform(k2, (3, 5, 7), dtype=jnp.float32,
                            minval=-0.5, maxval=1.5)
    outr = jax.block_until_ready(quant_unsigned(xr, max_val, num_bits=num_bits))
    _check(outr, _reference(xr, max_val, num_bits=num_bits), xr, step)

    print("KERNEL_OK")
</pallas_src>

<mosaic_0001>
module attributes {stable_mosaic.version = 11 : i64} {
  func.func @_quant_unsigned_kernel(%arg0: i32, %arg1: memref<2xf32, #tpu.memory_space<smem>>, %arg2: memref<2x1024xf32, #tpu.memory_space<vmem>>, %arg3: memref<2x1024xf32, #tpu.memory_space<vmem>>) attributes {dimension_semantics = [#tpu.dimension_semantics<parallel>], iteration_bounds = array<i64: 1>, scalar_prefetch = 0 : i64, scratch_operands = 0 : i64, tpu.core_type = #tpu.core_type<tc>, window_params = [{transform_indices = @transform_0, window_bounds = array<i64: 2>}, {transform_indices = @transform_1, window_bounds = array<i64: 2, 1024>}, {transform_indices = @transform_2, window_bounds = array<i64: 2, 1024>}]} {
    %c0 = arith.constant 0 : index
    %0 = memref.load %arg1[%c0] : memref<2xf32, #tpu.memory_space<smem>>
    %c1 = arith.constant 1 : index
    %1 = memref.load %arg1[%c1] : memref<2xf32, #tpu.memory_space<smem>>
    %c0_0 = arith.constant 0 : index
    %c0_1 = arith.constant 0 : index
    %2 = vector.load %arg2[%c0_0, %c0_1] : memref<2x1024xf32, #tpu.memory_space<vmem>>, vector<2x1024xf32>
    %3 = vector.broadcast %1 : f32 to vector<2x1024xf32>
    %4 = arith.mulf %2, %3 : vector<2x1024xf32>
    %5 = math.roundeven %4 : vector<2x1024xf32>
    %cst = arith.constant 0.000000e+00 : f32
    %cst_2 = arith.constant 2.550000e+02 : f32
    %6 = vector.broadcast %cst : f32 to vector<2x1024xf32>
    %7 = arith.maximumf %6, %5 : vector<2x1024xf32>
    %8 = vector.broadcast %cst_2 : f32 to vector<2x1024xf32>
    %9 = arith.minimumf %8, %7 : vector<2x1024xf32>
    %10 = vector.broadcast %0 : f32 to vector<2x1024xf32>
    %11 = arith.mulf %9, %10 : vector<2x1024xf32>
    %c0_3 = arith.constant 0 : index
    %c0_4 = arith.constant 0 : index
    %12 = vector.load %arg3[%c0_3, %c0_4] : memref<2x1024xf32, #tpu.memory_space<vmem>>, vector<2x1024xf32>
    tpu.vector_store %arg3[%c0_3, %c0_4], %11 {strides = array<i32>} : memref<2x1024xf32, #tpu.memory_space<vmem>>, vector<2x1024xf32>,
    return
  }
  func.func @transform_0(%arg0: i32) -> i32 {
    %c0_i32 = arith.constant 0 : i32
    %c0_i32_0 = arith.constant 0 : i32
    return %c0_i32 : i32
  }
  func.func @transform_1(%arg0: i32) -> (i32, i32) {
    %c0_i32 = arith.constant 0 : i32
    %c0_i32_0 = arith.constant 0 : i32
    return %arg0, %c0_i32 : i32, i32
  }
  func.func @transform_2(%arg0: i32) -> (i32, i32) {
    %c0_i32 = arith.constant 0 : i32
    %c0_i32_0 = arith.constant 0 : i32
    return %arg0, %c0_i32 : i32, i32
  }
}

</mosaic_0001>

<bundles_post_ra>
// kernel: tpu_custom_call.1
= control target key start
LH: loop header
LB: loop body
LE: loop exit
PB: predicated region body
PF: predicated region fallthrough
CT: control target
= control target key end

     0   :  { %7 = vsyncpa [#allocation5], 0  ;;  %s189_s0 = inlined_call_operand.hbm [shape: f32[2], index: 0, kind: input, shape index: {}]   ;;  %s190_s1 = inlined_call_operand.hbm [shape: f32[2,1024], index: 1, kind: input, shape index: {}]   ;;  %s191_s2 = inlined_call_operand.hbm [shape: f32[2,1024], index: 2, kind: output, shape index: {}]  }
   0x1   :  { %8 = vsyncpa [#allocation3], 0 }
   0x2   :  { %9 = vsyncpa [#allocation4], 0  ;;  %s75_s11 = scalar_lea.hbm %s189_s0, 16 }
   0x3   :  { %p76_p0 = scmp.ne.s32.totalorder %s189_s0, %s75_s11  ;;  %p79_p1 = scmp.lt.u32.totalorder %s75_s11, %s189_s0 }
   0x5   :  { %p81_p2 = pnand %p79_p1, %p76_p0 }
   0x7   :  { %84 = shalt.err (!%p81_p2)
}
   0x8   :  { %s135_s16 = smov [#allocation2]   ;;  %s136_s19 = smov [#allocation6]  }
   0x9   :  { %17 = dma.hbm_to_smem %s189_s0, 16, %s135_s16, [#allocation5]  }
   0xa   :  { %s24_s20 = sshll.u32 %s136_s19, 4  ;;  %s85_s23 = scalar_lea.hbm %s190_s1, 256  ;;  %s25_s20 = int_to_ptr.vmem [resolvable:$true] %s24_s20 }
   0xb   :  { %p86_p3 = scmp.ne.s32.totalorder %s190_s1, %s85_s23  ;;  %p89_p4 = scmp.lt.u32.totalorder %s85_s23, %s190_s1 }
   0xd   :  { %p91_p5 = pnand %p89_p4, %p86_p3 }
   0xf   :  { %94 = shalt.err (!%p91_p5)
}
  0x10   :  { %s95_s28 = scalar_lea.vmem %s25_s20, 256  ;;  %p100_p7 = scmp.lt.s32.totalorder %s25_s20, %s25_s20 }
  0x11   :  { %p96_p6 = scmp.ne.s32.totalorder %s25_s20, %s95_s28  ;;  %p101_p8 = scmp.lt.s32.totalorder %s95_s28, %s95_s28 }
  0x13   :  { %p102_p9 = por %p101_p8, %p100_p7 }
  0x15   :  { %p103_p10 = pnand %p102_p9, %p96_p6 }
  0x17   :  { %106 = shalt.err (!%p103_p10)
}
  0x18   :  { %27 = dma.hbm_to_vmem [thread:$0]  %s190_s1, 256, %s25_s20, [#allocation3]  }
  0x19   :  { %129 = dma.done.wait [#allocation5], 16  }
  0x1a   :  { %130 = vsyncadd [#allocation5], 4294967280 }
  0x1b   :  { %131 = dma.done.wait [#allocation3], 256  }
  0x1c   :  { %132 = vsyncadd [#allocation3], 4294967040 }
  0x1d   :  { %34 = sfence }
  0x1e   :  { %s69_s30 = sld [smem:[#allocation2 + $0x1]]  ;;  %s35_s3 = sld [smem:[#allocation2]]  ;;  %v37_v0 = vld [vmem:[#allocation6] sm:$0xff]  ;;  %v38_v1 = vld [vmem:[#allocation6 + $0x8] sm:$0xff] }
  0x1f   :  { %s137_s4 = smov [#allocation7]  }
  0x20   :  { %s59_s5 = sshll.u32 %s137_s4, 4  ;;  %s60_s5 = int_to_ptr.vmem [resolvable:$true] %s59_s5 }
  0x21   :  { %s107_s1 = scalar_lea.vmem %s60_s5, 256  ;;  %p112_p12 = scmp.lt.s32.totalorder %s60_s5, %s60_s5 }
  0x22   :  { %p108_p11 = scmp.ne.s32.totalorder %s60_s5, %s107_s1  ;;  %p113_p13 = scmp.lt.s32.totalorder %s107_s1, %s107_s1 }
  0x24   :  { %v39_v2 = vstv %s69_s30  ;;  %v48_v9 = vstv %s35_s3  ;;  %p114_p0 = por %p113_p13, %p112_p12 }
  0x25   :  { %v40_v3 = vmul.f32 %v39_v2, %v37_v0  ;;  %v41_v4 = vmul.f32 %v39_v2, %v38_v1 }
  0x26   :  { %p115_p1 = pnand %p114_p0, %p108_p11 }
  0x27   :  { %v70_v5 = vround.rtne.f32 %v40_v3  ;;  %v71_v6 = vround.rtne.f32 %v41_v4 }
  0x29   :  { %v44_v7 = vmax.f32 %v70_v5, 0.0  ;;  %v45_v8 = vmax.f32 %v71_v6, 0.0 }
  0x2b   :  { %v46_v10 = vmin.f32 %v44_v7, 255.0  ;;  %v47_v11 = vmin.f32 %v45_v8, 255.0 }
  0x2d   :  { %v49_v12 = vmul.f32 %v48_v9, %v46_v10  ;;  %v50_v13 = vmul.f32 %v48_v9, %v47_v11 }
  0x2f   :  { %51 = vst [vmem:[#allocation7] sm:$0xff] %v49_v12  ;;  %52 = vst [vmem:[#allocation7 + $0x8] sm:$0xff] %v50_v13 }
  0x30   :  { %118 = shalt.err (!%p115_p1)
}
  0x31   :  { %s119_s8 = scalar_lea.hbm %s191_s2, 256 }
  0x32   :  { %p120_p2 = scmp.ne.s32.totalorder %s191_s2, %s119_s8  ;;  %p123_p3 = scmp.lt.u32.totalorder %s119_s8, %s191_s2 }
  0x34   :  { %p125_p4 = pnand %p123_p3, %p120_p2 }
  0x36   :  { %128 = shalt.err (!%p125_p4)
}
  0x37   :  { %62 = dma.vmem_to_hbm [thread:$0]  %s60_s5, 256, %s191_s2, [#allocation4]  }
  0x38   :  { %133 = dma.done.wait [#allocation4], 256  }
  0x39   :  { %134 = vsyncadd [#allocation4], 4294967040 }
  0x3a   :  { %66 = vsyncpa [#allocation3], 1 }
  0x3b   :  { %67 = vsyncpa [#allocation4], 1 }
  0x3c   :  { %68 = vsyncpa [#allocation5], 1 }

</bundles_post_ra>
